<compile_context>
chip_gen: v7x
topology: tpu7x:2x2x1
jax: 0.10.0
libtpu: 0.0.40
codegen_flags: <defaults>
</compile_context>

<pallas_src>
import jax
import jax.numpy as jnp
from jax import lax
from jax.experimental import pallas as pl
from jax.experimental.pallas import tpu as pltpu


def _attention_kernel(hs_ref,                        # [Bb, S, E] f32
                      ht_ref,                        # [Bb, D]    f32
                      len_ref,                       # [Bb, 1]    int32
                      wa_w_ref,                      # [D, E]     f32  (torch layout)
                      wa_b_ref,                      # [1, D]     f32
                      wc_wt_ref,                     # [E, C]     f32  (pre-transposed)
                      wc_b_ref,                      # [1, C]     f32
                      alpha_ref,                     # [Bb, S]    f32 out
                      ctx_ref):                      # [Bb, C]    f32 out
    hs = hs_ref[...]                                 # [Bb, S, E]
    ht = ht_ref[...]                                 # [Bb, D]
    lengths = len_ref[...]                           # [Bb, 1] int32

    Bb, S, _ = hs.shape

    # ---- rank-1 rewrite of the Wa path ------------------------------------
    # u[b]      = ht[b] @ Wa_w          : [Bb, E]   (MXU)
    # e_bias[b] = ht[b] . Wa_b          : [Bb, 1]   (VPU mul + lane reduce)
    u = jnp.dot(ht, wa_w_ref[...], preferred_element_type=jnp.float32)
    e_bias = jnp.sum(ht * wa_b_ref[...], axis=-1, keepdims=True)

    # energy[b, s] = u[b] . hs[b, s] + e_bias[b]  (VPU multiply + lane reduce;
    # keeps the MXU free and avoids the [S, D] intermediate entirely)
    energy = jnp.sum(u[:, None, :] * hs, axis=-1) + e_bias       # [Bb, S]

    # LeakyReLU(negative_slope=0.2)
    energy = jnp.where(energy >= 0, energy, 0.2 * energy)

    # mask fill: positions >= state_len[b] get -10000 (exact PyTorch value)
    pos = lax.broadcasted_iota(jnp.int32, (Bb, S), 1)
    energy = jnp.where(pos >= lengths, jnp.float32(-10000.0), energy)

    # softmax over the source dimension (lanes); EUP reciprocal for the denom
    energy = energy - jnp.max(energy, axis=-1, keepdims=True)
    p = jnp.exp(energy)
    alpha = p * pl.reciprocal(jnp.sum(p, axis=-1, keepdims=True), approx=True)

    # ---- rank-1 rewrite of the Wc path ------------------------------------
    # v[b]       = alpha[b] @ hs[b]               : [Bb, E]  (VPU + sublane reduce)
    # context[b] = v[b] @ Wc_w^T + Wc_b           : [Bb, C]  (MXU)
    # (valid because sum(alpha[b]) == 1)
    v = jnp.sum(alpha[:, :, None] * hs, axis=1)                  # [Bb, E]
    ctx = jnp.dot(v, wc_wt_ref[...],
                  preferred_element_type=jnp.float32) + wc_b_ref[...]

    alpha_ref[...] = alpha
    ctx_ref[...] = ctx


def _pick_block_b(B, S, E, bytes_per_elem=4, budget_bytes=4 * 1024 * 1024):
    """Largest batch block that (a) divides B, (b) is either == B or a multiple
    of 8 (BlockSpec sublane rule), and (c) keeps one hs tile <= budget so the
    2-deep pipeline fits comfortably in VMEM even on v7x (64 MiB)."""
    if B * S * E * bytes_per_elem <= budget_bytes:
        return B
    best = None
    for d in range(8, B + 1, 8):
        if B % d == 0 and d * S * E * bytes_per_elem <= budget_bytes:
            best = d
    return best if best is not None else B


def attention_forward(hs, ht, state_len, wa_w, wa_b, wc_w, wc_b, *, block_b=None):
    """hs: [B,S,E] f32, ht: [B,D] f32, state_len: [B] int32.
    Weights in torch nn.Linear convention (wa_w: [D,E], wc_w: [C,E]),
    biases of shape [D]/[1,D] and [C]/[1,C]."""
    B, S, E = hs.shape
    D = ht.shape[-1]
    C = wc_w.shape[0]

    if block_b is None:
        block_b = _pick_block_b(B, S, E)
    assert B % block_b == 0
    grid = (B // block_b,)

    # One-time wrapper-side layout plumbing (keeps all transposes out of the
    # per-step kernel body).
    hs = hs.astype(jnp.float32)
    ht = ht.astype(jnp.float32)
    wa_w = wa_w.astype(jnp.float32)                       # [D, E]
    wc_wt = wc_w.astype(jnp.float32).T                    # [E, C]
    wa_b2 = wa_b.astype(jnp.float32).reshape(1, D)
    wc_b2 = wc_b.astype(jnp.float32).reshape(1, C)
    len2 = state_len.astype(jnp.int32).reshape(B, 1)

    grid_spec = pltpu.PrefetchScalarGridSpec(
        num_scalar_prefetch=0,
        grid=grid,
        in_specs=[
            pl.BlockSpec((block_b, S, E), lambda i: (i, 0, 0)),   # hs (batch block)
            pl.BlockSpec((block_b, D),    lambda i: (i, 0)),      # ht
            pl.BlockSpec((block_b, 1),    lambda i: (i, 0)),      # state_len
            pl.BlockSpec((D, E),          lambda i: (0, 0)),      # Wa weight
            pl.BlockSpec((1, D),          lambda i: (0, 0)),      # Wa bias
            pl.BlockSpec((E, C),          lambda i: (0, 0)),      # Wc weight (pre-T)
            pl.BlockSpec((1, C),          lambda i: (0, 0)),      # Wc bias
        ],
        out_specs=[
            pl.BlockSpec((block_b, S), lambda i: (i, 0)),         # alpha
            pl.BlockSpec((block_b, C), lambda i: (i, 0)),         # context
        ],
    )

    return pl.pallas_call(
        _attention_kernel,
        out_shape=(jax.ShapeDtypeStruct((B, S), jnp.float32),
                   jax.ShapeDtypeStruct((B, C), jnp.float32)),
        grid_spec=grid_spec,
        compiler_params=pltpu.CompilerParams(
            dimension_semantics=("parallel",),        # batch blocks split across TCs (v7x)
            vmem_limit_bytes=32 * 1024 * 1024),
    )(hs, ht, len2, wa_w, wa_b2, wc_wt, wc_b2)


def attention_reference(hs, ht, state_len, wa_w, wa_b, wc_w, wc_b):
    """Pure-JAX reference mirroring the PyTorch forward."""
    wa_hs = jnp.einsum('bse,de->bsd', hs, wa_w) + wa_b.reshape(1, 1, -1)   # [B,S,D]
    energy = jnp.einsum('bd,bsd->bs', ht, wa_hs)                           # [B,S]
    energy = jnp.where(energy >= 0, energy, 0.2 * energy)                  # LeakyReLU(0.2)
    pos = jnp.arange(hs.shape[1])[None, :]
    energy = jnp.where(pos >= state_len[:, None], -10000.0, energy)
    alpha = jax.nn.softmax(energy, axis=-1)
    wc_hs = jnp.einsum('bse,ce->bsc', hs, wc_w) + wc_b.reshape(1, 1, -1)   # [B,S,C]
    context = jnp.einsum('bs,bsc->bc', alpha, wc_hs)                       # [B,C]
    return alpha, context


if __name__ == "__main__":
    # Small shapes consistent with the module: B=2 batch, S=8 source steps,
    # encode_dim=32, decode_dim=32, context_dim=32.
    B, S, E, D, C = 2, 8, 32, 32, 32

    key = jax.random.PRNGKey(0)
    k_hs, k_ht, k_waw, k_wab, k_wcw, k_wcb = jax.random.split(key, 6)

    hs = jax.random.normal(k_hs, (B, S, E), dtype=jnp.float32)
    ht = jax.random.normal(k_ht, (B, D), dtype=jnp.float32)
    state_len = jnp.array([6, 8], dtype=jnp.int32)                  # valid lengths per batch

    # Deterministic synthetic parameters (torch nn.Linear shapes: [out, in]).
    wa_w = jax.random.normal(k_waw, (D, E), dtype=jnp.float32) * 0.1
    wa_b = jax.random.normal(k_wab, (1, D), dtype=jnp.float32) * 0.1
    wc_w = jax.random.normal(k_wcw, (C, E), dtype=jnp.float32) * 0.1
    wc_b = jax.random.normal(k_wcb, (1, C), dtype=jnp.float32) * 0.1

    alpha, context = attention_forward(hs, ht, state_len, wa_w, wa_b, wc_w, wc_b)
    jax.block_until_ready((alpha, context))

    alpha_ref, context_ref = attention_reference(hs, ht, state_len,
                                                 wa_w, wa_b, wc_w, wc_b)
    assert jnp.allclose(alpha, alpha_ref, atol=2e-3, rtol=2e-3)
    assert jnp.allclose(context, context_ref, atol=2e-3, rtol=2e-3)

    print("KERNEL_OK")
</pallas_src>

<mosaic_0001>
module attributes {stable_mosaic.version = 11 : i64} {
  func.func @_attention_kernel(%arg0: i32, %arg1: memref<2x8x32xf32, #tpu.memory_space<vmem>>, %arg2: memref<2x32xf32, #tpu.memory_space<vmem>>, %arg3: memref<2x1xi32, #tpu.memory_space<vmem>>, %arg4: memref<32x32xf32, #tpu.memory_space<vmem>>, %arg5: memref<1x32xf32, #tpu.memory_space<vmem>>, %arg6: memref<32x32xf32, #tpu.memory_space<vmem>>, %arg7: memref<1x32xf32, #tpu.memory_space<vmem>>, %arg8: memref<2x8xf32, #tpu.memory_space<vmem>>, %arg9: memref<2x32xf32, #tpu.memory_space<vmem>>) attributes {dimension_semantics = [#tpu.dimension_semantics<parallel>], iteration_bounds = array<i64: 1>, scalar_prefetch = 0 : i64, scratch_operands = 0 : i64, tpu.core_type = #tpu.core_type<tc>, window_params = [{transform_indices = @transform_0, window_bounds = array<i64: 2, 8, 32>}, {transform_indices = @transform_1, window_bounds = array<i64: 2, 32>}, {transform_indices = @transform_2, window_bounds = array<i64: 2, 1>}, {pipeline_mode = #tpu.pipeline_mode<synchronous>, transform_indices = @transform_3, window_bounds = array<i64: 32, 32>}, {pipeline_mode = #tpu.pipeline_mode<synchronous>, transform_indices = @transform_4, window_bounds = array<i64: 1, 32>}, {pipeline_mode = #tpu.pipeline_mode<synchronous>, transform_indices = @transform_5, window_bounds = array<i64: 32, 32>}, {pipeline_mode = #tpu.pipeline_mode<synchronous>, transform_indices = @transform_6, window_bounds = array<i64: 1, 32>}, {transform_indices = @transform_7, window_bounds = array<i64: 2, 8>}, {transform_indices = @transform_8, window_bounds = array<i64: 2, 32>}]} {
    %c0 = arith.constant 0 : index
    %c0_0 = arith.constant 0 : index
    %c0_1 = arith.constant 0 : index
    %0 = vector.load %arg1[%c0, %c0_0, %c0_1] : memref<2x8x32xf32, #tpu.memory_space<vmem>>, vector<2x8x32xf32>
    %c0_2 = arith.constant 0 : index
    %c0_3 = arith.constant 0 : index
    %1 = vector.load %arg2[%c0_2, %c0_3] : memref<2x32xf32, #tpu.memory_space<vmem>>, vector<2x32xf32>
    %c0_4 = arith.constant 0 : index
    %c0_5 = arith.constant 0 : index
    %2 = vector.load %arg3[%c0_4, %c0_5] : memref<2x1xi32, #tpu.memory_space<vmem>>, vector<2x1xi32>
    %c0_6 = arith.constant 0 : index
    %c0_7 = arith.constant 0 : index
    %3 = vector.load %arg4[%c0_6, %c0_7] : memref<32x32xf32, #tpu.memory_space<vmem>>, vector<32x32xf32>
    %cst = arith.constant dense<0.000000e+00> : vector<2x32xf32>
    %4 = tpu.matmul %1, %3, %cst {dimension_numbers = #tpu.dot_dimension_numbers<[1], [0], [0], [1], [0, 0, 1, 1], [], []>} : vector<2x32xf32>, vector<32x32xf32>, vector<2x32xf32> -> vector<2x32xf32>
    %c0_8 = arith.constant 0 : index
    %c0_9 = arith.constant 0 : index
    %5 = vector.load %arg5[%c0_8, %c0_9] : memref<1x32xf32, #tpu.memory_space<vmem>>, vector<1x32xf32>
    %6 = vector.broadcast %5 : vector<1x32xf32> to vector<2x32xf32>
    %7 = arith.mulf %1, %6 : vector<2x32xf32>
    %cst_10 = arith.constant dense<0.000000e+00> : vector<2xf32>
    %8 = vector.multi_reduction <add>, %7, %cst_10 [1] : vector<2x32xf32> to vector<2xf32>
    %9 = vector.shape_cast %8 : vector<2xf32> to vector<2x1xf32>
    %10 = vector.shape_cast %4 : vector<2x32xf32> to vector<2x1x32xf32>
    %11 = vector.broadcast %10 : vector<2x1x32xf32> to vector<2x8x32xf32>
    %12 = arith.mulf %11, %0 : vector<2x8x32xf32>
    %cst_11 = arith.constant dense<0.000000e+00> : vector<2x8xf32>
    %13 = vector.multi_reduction <add>, %12, %cst_11 [2] : vector<2x8x32xf32> to vector<2x8xf32>
    %14 = vector.broadcast %9 : vector<2x1xf32> to vector<2x8xf32>
    %15 = arith.addf %13, %14 : vector<2x8xf32>
    %cst_12 = arith.constant 0.000000e+00 : f32
    %16 = vector.broadcast %cst_12 : f32 to vector<2x8xf32>
    %17 = arith.cmpf oge, %15, %16 : vector<2x8xf32>
    %cst_13 = arith.constant 2.000000e-01 : f32
    %18 = vector.broadcast %cst_13 : f32 to vector<2x8xf32>
    %19 = arith.mulf %18, %15 : vector<2x8xf32>
    %20 = arith.select %17, %15, %19 : vector<2x8xi1>, vector<2x8xf32>
    %21 = tpu.iota {dimensions = array<i32: 1>} : vector<2x8xi32>
    %22 = vector.broadcast %2 : vector<2x1xi32> to vector<2x8xi32>
    %23 = arith.cmpi sge, %21, %22 : vector<2x8xi32>
    %cst_14 = arith.constant -1.000000e+04 : f32
    %24 = vector.broadcast %cst_14 : f32 to vector<2x8xf32>
    %25 = arith.select %23, %24, %20 : vector<2x8xi1>, vector<2x8xf32>
    %cst_15 = arith.constant dense<0xFF800000> : vector<2xf32>
    %26 = vector.multi_reduction <maximumf>, %25, %cst_15 [1] : vector<2x8xf32> to vector<2xf32>
    %27 = vector.shape_cast %26 : vector<2xf32> to vector<2x1xf32>
    %28 = vector.broadcast %27 : vector<2x1xf32> to vector<2x8xf32>
    %29 = arith.subf %25, %28 : vector<2x8xf32>
    %30 = math.exp %29 : vector<2x8xf32>
    %cst_16 = arith.constant dense<0.000000e+00> : vector<2xf32>
    %31 = vector.multi_reduction <add>, %30, %cst_16 [1] : vector<2x8xf32> to vector<2xf32>
    %32 = vector.shape_cast %31 : vector<2xf32> to vector<2x1xf32>
    %33 = tpu.reciprocal %32 {approx = true} : vector<2x1xf32> -> vector<2x1xf32>
    %34 = vector.broadcast %33 : vector<2x1xf32> to vector<2x8xf32>
    %35 = arith.mulf %30, %34 : vector<2x8xf32>
    %36 = vector.shape_cast %35 : vector<2x8xf32> to vector<2x8x1xf32>
    %37 = vector.broadcast %36 : vector<2x8x1xf32> to vector<2x8x32xf32>
    %38 = arith.mulf %37, %0 : vector<2x8x32xf32>
    %cst_17 = arith.constant dense<0.000000e+00> : vector<2x32xf32>
    %39 = vector.multi_reduction <add>, %38, %cst_17 [1] : vector<2x8x32xf32> to vector<2x32xf32>
    %c0_18 = arith.constant 0 : index
    %c0_19 = arith.constant 0 : index
    %40 = vector.load %arg6[%c0_18, %c0_19] : memref<32x32xf32, #tpu.memory_space<vmem>>, vector<32x32xf32>
    %cst_20 = arith.constant dense<0.000000e+00> : vector<2x32xf32>
    %41 = tpu.matmul %39, %40, %cst_20 {dimension_numbers = #tpu.dot_dimension_numbers<[1], [0], [0], [1], [0, 0, 1, 1], [], []>} : vector<2x32xf32>, vector<32x32xf32>, vector<2x32xf32> -> vector<2x32xf32>
    %c0_21 = arith.constant 0 : index
    %c0_22 = arith.constant 0 : index
    %42 = vector.load %arg7[%c0_21, %c0_22] : memref<1x32xf32, #tpu.memory_space<vmem>>, vector<1x32xf32>
    %43 = vector.broadcast %42 : vector<1x32xf32> to vector<2x32xf32>
    %44 = arith.addf %41, %43 : vector<2x32xf32>
    %c0_23 = arith.constant 0 : index
    %c0_24 = arith.constant 0 : index
    %45 = vector.load %arg8[%c0_23, %c0_24] : memref<2x8xf32, #tpu.memory_space<vmem>>, vector<2x8xf32>
    tpu.vector_store %arg8[%c0_23, %c0_24], %35 {strides = array<i32>} : memref<2x8xf32, #tpu.memory_space<vmem>>, vector<2x8xf32>,
    %c0_25 = arith.constant 0 : index
    %c0_26 = arith.constant 0 : index
    %46 = vector.load %arg9[%c0_25, %c0_26] : memref<2x32xf32, #tpu.memory_space<vmem>>, vector<2x32xf32>
    tpu.vector_store %arg9[%c0_25, %c0_26], %44 {strides = array<i32>} : memref<2x32xf32, #tpu.memory_space<vmem>>, vector<2x32xf32>,
    return
  }
  func.func @transform_0(%arg0: i32) -> (i32, i32, i32) {
    %c0_i32 = arith.constant 0 : i32
    %c0_i32_0 = arith.constant 0 : i32
    %c0_i32_1 = arith.constant 0 : i32
    return %arg0, %c0_i32, %c0_i32_0 : i32, i32, i32
  }
  func.func @transform_1(%arg0: i32) -> (i32, i32) {
    %c0_i32 = arith.constant 0 : i32
    %c0_i32_0 = arith.constant 0 : i32
    return %arg0, %c0_i32 : i32, i32
  }
  func.func @transform_2(%arg0: i32) -> (i32, i32) {
    %c0_i32 = arith.constant 0 : i32
    %c0_i32_0 = arith.constant 0 : i32
    return %arg0, %c0_i32 : i32, i32
  }
  func.func @transform_3(%arg0: i32) -> (i32, i32) {
    %c0_i32 = arith.constant 0 : i32
    %c0_i32_0 = arith.constant 0 : i32
    %c0_i32_1 = arith.constant 0 : i32
    return %c0_i32, %c0_i32_0 : i32, i32
  }
  func.func @transform_4(%arg0: i32) -> (i32, i32) {
    %c0_i32 = arith.constant 0 : i32
    %c0_i32_0 = arith.constant 0 : i32
    %c0_i32_1 = arith.constant 0 : i32
    return %c0_i32, %c0_i32_0 : i32, i32
  }
  func.func @transform_5(%arg0: i32) -> (i32, i32) {
    %c0_i32 = arith.constant 0 : i32
    %c0_i32_0 = arith.constant 0 : i32
    %c0_i32_1 = arith.constant 0 : i32
    return %c0_i32, %c0_i32_0 : i32, i32
  }
  func.func @transform_6(%arg0: i32) -> (i32, i32) {
    %c0_i32 = arith.constant 0 : i32
    %c0_i32_0 = arith.constant 0 : i32
    %c0_i32_1 = arith.constant 0 : i32
    return %c0_i32, %c0_i32_0 : i32, i32
  }
  func.func @transform_7(%arg0: i32) -> (i32, i32) {
    %c0_i32 = arith.constant 0 : i32
    %c0_i32_0 = arith.constant 0 : i32
    return %arg0, %c0_i32 : i32, i32
  }
  func.func @transform_8(%arg0: i32) -> (i32, i32) {
    %c0_i32 = arith.constant 0 : i32
    %c0_i32_0 = arith.constant 0 : i32
    return %arg0, %c0_i32 : i32, i32
  }
}

</mosaic_0001>

<bundles_post_ra>
// kernel: tpu_custom_call.1
= control target key start
LH: loop header
LB: loop body
LE: loop exit
PB: predicated region body
PF: predicated region fallthrough
CT: control target
= control target key end

     0   :  { %14 = vsyncpa [#allocation3], 0  ;;  %s777_s0 = inlined_call_operand.hbm [shape: f32[2,8,32], index: 0, kind: input, shape index: {}]   ;;  %s778_s1 = inlined_call_operand.vmem [shape: f32[2,32], index: 1, kind: input, shape index: {}]   ;;  %s779_s2 = inlined_call_operand.vmem [shape: s32[2,1], index: 2, kind: input, shape index: {}]   ;;  %s780_s3 = inlined_call_operand.hbm [shape: f32[32,32], index: 3, kind: input, shape index: {}]   ;;  %s781_s4 = inlined_call_operand.vmem [shape: f32[1,32], index: 4, kind: input, shape index: {}]   ;;  %s782_s5 = inlined_call_operand.hbm [shape: f32[32,32], index: 5, kind: input, shape index: {}]   ;;  %s783_s6 = inlined_call_operand.vmem [shape: f32[1,32], index: 6, kind: input, shape index: {}]   ;;  %s784_s7 = inlined_call_operand.hbm [shape: f32[2,8], index: 7, kind: output, shape index: {0}]   ;;  %s785_s8 = inlined_call_operand.hbm [shape: f32[2,32], index: 8, kind: output, shape index: {1}]  }
   0x1   :  { %15 = vsyncpa [#allocation6], 0 }
   0x2   :  { %16 = vsyncpa [#allocation4], 0 }
   0x3   :  { %17 = vsyncpa [#allocation10], 0  ;;  %s595_s27 = smov [#allocation5]   ;;  %s596_s29 = smov [#allocation2]  }
   0x4   :  { %s39_s28 = sshll.u32 %s595_s27, 4  ;;  %s23_s30 = sshll.u32 %s596_s29, 4  ;;  %s40_s28 = int_to_ptr.vmem [resolvable:$true] %s39_s28  ;;  %s652_s30 = int_to_ptr.vmem [resolvable:$true] %s23_s30 }
   0x5   :  { %s477_s11 = scalar_lea.hbm %s780_s3, 512 }
   0x6   :  { %p478_p0 = scmp.ne.s32.totalorder %s780_s3, %s477_s11  ;;  %p481_p1 = scmp.lt.u32.totalorder %s477_s11, %s780_s3 }
   0x8   :  { %p483_p2 = pnand %p481_p1, %p478_p0 }
   0xa   :  { %486 = shalt.err (!%p483_p2)
}
   0xb   :  { %s487_s16 = scalar_lea.vmem %s40_s28, 512  ;;  %p492_p4 = scmp.lt.s32.totalorder %s40_s28, %s40_s28 }
   0xc   :  { %p488_p3 = scmp.ne.s32.totalorder %s40_s28, %s487_s16  ;;  %p493_p5 = scmp.lt.s32.totalorder %s487_s16, %s487_s16 }
   0xe   :  { %p494_p6 = por %p493_p5, %p492_p4 }
  0x10   :  { %p495_p7 = pnand %p494_p6, %p488_p3 }
  0x12   :  { %498 = shalt.err (!%p495_p7)
}
  0x13   :  { %s597_s17 = smov 128   ;;  %s598_s18 = smov 8  }
  0x14   :  { %45 = dma.hbm_to_vmem [thread:$0]  %s780_s3, 512, %s40_s28, [#allocation6], %s597_s17, %s597_s17, %s598_s18  }
  0x15   :  { %s499_s23 = scalar_lea.hbm %s777_s0, 256 }
  0x16   :  { %p500_p8 = scmp.ne.s32.totalorder %s777_s0, %s499_s23  ;;  %p503_p9 = scmp.lt.u32.totalorder %s499_s23, %s777_s0 }
  0x18   :  { %p505_p10 = pnand %p503_p9, %p500_p8 }
  0x1a   :  { %508 = shalt.err (!%p505_p10)
}
  0x1b   :  { %s509_s29 = scalar_lea.vmem %s652_s30, 256  ;;  %p514_p12 = scmp.lt.s32.totalorder %s652_s30, %s652_s30 }
  0x1c   :  { %p510_p11 = scmp.ne.s32.totalorder %s652_s30, %s509_s29  ;;  %p515_p13 = scmp.lt.s32.totalorder %s509_s29, %s509_s29 }
  0x1e   :  { %p516_p0 = por %p515_p13, %p514_p12 }
  0x20   :  { %p517_p1 = pnand %p516_p0, %p510_p11 }
  0x22   :  { %520 = shalt.err (!%p517_p1)
}
  0x23   :  { %29 = dma.hbm_to_vmem [thread:$0]  %s777_s0, 256, %s652_s30, [#allocation3], %s597_s17, %s597_s17, %s598_s18  }
  0x24   :  { %s599_s9 = smov [#allocation7]   ;;  %s521_s13 = scalar_lea.hbm %s782_s5, 512 }
  0x25   :  { %s53_s10 = sshll.u32 %s599_s9, 4  ;;  %p522_p2 = scmp.ne.s32.totalorder %s782_s5, %s521_s13  ;;  %s54_s10 = int_to_ptr.vmem [resolvable:$true] %s53_s10 }
  0x26   :  { %p525_p3 = scmp.lt.u32.totalorder %s521_s13, %s782_s5 }
  0x28   :  { %p527_p4 = pnand %p525_p3, %p522_p2 }
  0x2a   :  { %530 = shalt.err (!%p527_p4)
}
  0x2b   :  { %s531_s20 = scalar_lea.vmem %s54_s10, 512  ;;  %p536_p6 = scmp.lt.s32.totalorder %s54_s10, %s54_s10 }
  0x2c   :  { %p532_p5 = scmp.ne.s32.totalorder %s54_s10, %s531_s20  ;;  %p537_p7 = scmp.lt.s32.totalorder %s531_s20, %s531_s20 }
  0x2e   :  { %p538_p8 = por %p537_p7, %p536_p6 }
  0x30   :  { %p539_p9 = pnand %p538_p8, %p532_p5 }
  0x32   :  { %542 = shalt.err (!%p539_p9)
}
  0x33   :  { %59 = dma.hbm_to_vmem [thread:$0]  %s782_s5, 512, %s54_s10, [#allocation6], %s597_s17, %s597_s17, %s598_s18  }
  0x34   :  { %587 = dma.done.wait [#allocation3], 256  }
  0x35   :  { %588 = vsyncadd [#allocation3], 4294967040 }
  0x36   :  { %589 = dma.done.wait [#allocation6], 1024  }
  0x37   :  { %590 = vsyncadd [#allocation6], 4294966272  ;;  %v600_v0 = vmov 0.0|0.0   ;;  %vm601_vm0 = vmmov 0   ;;  %v602_v1 = vmov 0.0   ;;  %v75_v2 = vld [vmem:[#allocation5] sm:$0xff]  ;;  %v169_v14 = vlaneseq }
  0x38   :  { %447 = vmatprep.subr.bf16.mxu0 %v600_v0  ;;  %433 = vmatprep.mubr.msk.f32.mxu0 %vm601_vm0, %v602_v1  ;;  %v76_v3 = vld [vmem:[#allocation5 + $0x8] sm:$0xff]  ;;  %v77_v4 = vld [vmem:[#allocation5 + $0x10] sm:$0xff]  ;;  %v78_v6 = vld [vmem:[#allocation5 + $0x18] sm:$0xff]  ;;  %vm79_vm1 = vcmask 261120   ;;  %vm161_vm2 = vcmask 254976   ;;  %v604_v33 = vmov 0  }
  0x39   :  { %453 = vmatprep.subr.bf16.mxu1 %v600_v0  ;;  %444 = vmatprep.mubr.msk.f32.mxu1 %vm601_vm0, %v602_v1  ;;  %v448_v5 = vpack.c.bf16 %v76_v3, %v75_v2  ;;  %v451_v7 = vpack.c.bf16 %v78_v6, %v77_v4  ;;  %v73_v8 = vld [vmem:[%s778_s1] sm:$0x3]  ;;  %v603_v12 = vmov 1966171168   ;;  %v715_v16 = vshrl.u32 %v169_v14, 7  ;;  %v724_v27 = vld [vmem:[#allocation2 + $0x8] sm:$0xff] }
  0x3a   :  { %v412_v9 = vld [vmem:[%s781_s4] ss:$0 sm:$0xff]  ;;  %v167_v13 = vunpack.c.l.s4 %v603_v12  ;;  %471 = vset.pattern.permute.xlu1 %v604_v33  ;;  %472 = vset.pattern.permute.xlu0 %v604_v33  ;;  %v226_v47 = vand.u32 127, %v169_v14  ;;  %vm247_vm5 = vcmask 1041409   ;;  %vm251_vm6 = vcmask 58368   ;;  %v293_v2 = vld [vmem:[#allocation7] sm:$0xff] }
  0x3b   :  { %449 = vmatpush3.bf16.msra.mxu0 %v448_v5  ;;  %v160_v10 = vmul.f32 %v412_v9, %v73_v8  ;;  %v719_v21 = vsub.s32 0, %v715_v16  ;;  %v721_v24 = vld [vmem:[#allocation2] sm:$0xff]  ;;  %v213_v35 = vsub.s32 1, %v715_v16  ;;  %v294_v3 = vld [vmem:[#allocation7 + $0x8] sm:$0xff] }
  0x3c   :  { %450 = vmatprep.subr.bf16.mxu0 %v600_v0  ;;  %v168_v15 = vunpack.c.0.s8 %v167_v13  ;;  %v74_v46 = vld [vmem:[%s779_s2] sm:$0x3]  ;;  %v241_v48 = vsub.s32 %v226_v47, %v715_v16  ;;  %v454_v5 = vpack.c.bf16 %v294_v3, %v293_v2  ;;  %s605_s2 = smov [#allocation8]  }
  0x3d   :  { %v162_v11 = vsel %vm161_vm2, %v160_v10, 0.0  ;;  %v295_v6 = vld [vmem:[#allocation7 + $0x10] sm:$0xff]  ;;  %s387_s22 = sshll.u32 %s605_s2, 4  ;;  %s388_s22 = int_to_ptr.vmem [resolvable:$true] %s387_s22 }
  0x3e   :  { %163 = vadd.xlane.f32.xlu0 %v162_v11  ;;  %v171_v17 = vsub.s32 %v168_v15, %v715_v16  ;;  %455 = vmatpush3.bf16.msra.mxu1 %v454_v5  ;;  %s543_s23 = scalar_lea.vmem %s388_s22, 32  ;;  %p548_p11 = scmp.lt.s32.totalorder %s388_s22, %s388_s22 }
  0x3f   :  { %452 = vmatpush3.bf16.msra.mxu0 %v451_v7  ;;  %456 = vmatprep.subr.bf16.mxu1 %v600_v0  ;;  %v296_v7 = vld [vmem:[#allocation7 + $0x18] sm:$0xff]  ;;  %p544_p10 = scmp.ne.s32.totalorder %s388_s22, %s543_s23  ;;  %p549_p12 = scmp.lt.s32.totalorder %s543_s23, %s543_s23 }
  0x40   :  { %v457_v9 = vpack.c.bf16 %v296_v7, %v295_v6 }
  0x41   :  { %p550_p13 = por %p549_p12, %p548_p11 }
  0x42   :  { %434 = vmatmul.mubr.msk.f32.vlgmr.msra.gmra.mrb[0].mxu0 %vm79_vm1, %v73_v8  ;;  %458 = vmatpush3.bf16.msra.mxu1 %v457_v9 }
  0x43   :  { %p551_p0 = pnand %p550_p13, %p544_p10 }
  0xcb   :  { %v164_v34 = vpop.xlane.xlu0 %163 }
  0xcc   :  { %v210_v36 = vrot.slane %v164_v34, %v719_v21  ;;  %v214_v38 = vrot.slane %v164_v34, %v213_v35 }
 0x115   :  { %v149_v18 = vpop.f32.mrb[0].mxu0 }
 0x116   :  { %v172_v19 = vrot.slane %v149_v18, %v171_v17  ;;  %v435_v20 = vpop.f32.mrb[1].mxu0 }
 0x118   :  { %v173_v22 = vcombine.high %v172_v19, %v172_v19  ;;  %v180_v23 = vrot.slane %v172_v19, %v171_v17 }
 0x11a   :  { %v187_v25 = vrot.slane %v173_v22, %v171_v17  ;;  %v191_v26 = vrot.slane %v180_v23, %v719_v21 }
 0x11c   :  { %v198_v28 = vmul.f32 %v191_v26, %v721_v24  ;;  %v195_v29 = vrot.slane %v187_v25, %v719_v21 }
 0x11e   :  { %v200_v30 = vsel %vm79_vm1, %v198_v28, 0.0  ;;  %v199_v31 = vmul.f32 %v195_v29, %v724_v27 }
 0x11f   :  { %201 = vadd.xlane.f32.xlu0 %v200_v30 }
 0x120   :  { %v203_v32 = vsel %vm79_vm1, %v199_v31, 0.0 }
 0x121   :  { %204 = vadd.xlane.f32.xlu1 %v203_v32 }
 0x1ac   :  { %v202_v37 = vpop.xlane.xlu0 %201 }
 0x1ad   :  { %v217_v39 = vadd.f32 %v210_v36, %v202_v37 }
 0x1ae   :  { %v205_v40 = vpop.xlane.xlu1 %204 }
 0x1af   :  { %v221_v41 = vmul.f32 0.2, %v217_v39  ;;  %v218_v42 = vadd.f32 %v214_v38, %v205_v40  ;;  %vm219_vm3 = vcmp.ge.f32.partialorder %v217_v39, 0.0 }
 0x1b1   :  { %v222_v43 = vmul.f32 0.2, %v218_v42  ;;  %v223_v44 = vsel %vm219_vm3, %v217_v39, %v221_v41  ;;  %vm220_vm4 = vcmp.ge.f32.partialorder %v218_v42, 0.0 }
 0x1b2   :  { %234 = vperm.xlu1 %471, %v223_v44  }
 0x1b3   :  { %v224_v45 = vsel %vm220_vm4, %v218_v42, %v222_v43 }
 0x1b4   :  { %237 = vperm.xlu0 %472, %v224_v45  }
 0x1b6   :  { %228 = vperm.xlu1 %471, %v74_v46  }
 0x231   :  { %v235_v49 = vpop.permute.xlu1 %234 }
 0x232   :  { %v242_v51 = vrot.slane %v235_v49, %v241_v48 }
 0x233   :  { %v238_v50 = vpop.permute.xlu0 %237 }
 0x234   :  { %v246_v52 = vrot.slane %v238_v50, %v241_v48 }
 0x235   :  { %v229_v53 = vpop.permute.xlu1 %228 }
 0x236   :  { %vm230_vm7 = vcmp.ge.s32.totalorder %v226_v47, %v229_v53  ;;  %v248_v54 = vsel %vm247_vm5, %v246_v52, %v242_v51 }
 0x237   :  { %v250_v55 = vsel %vm230_vm7, -10000.0, %v248_v54 }
 0x238   :  { %v252_v56 = vsel %vm251_vm6, %v250_v55, -inf }
 0x239   :  { %253 = vmax.xlane.f32.xlu1 %v252_v56 }
 0x2c6   :  { %v254_v57 = vpop.xlane.xlu1 %253 }
 0x2c7   :  { %v255_v58 = vsub.f32 %v250_v55, %v254_v57 }
 0x2c9   :  { %v256_v59 = vmul.f32 1.442695, %v255_v58 }
 0x2cb   :  { %473 = vpow2.f32 %v256_v59 }
 0x2d5   :  { %v474_v60 = vpop.eup %473 }
 0x2d6   :  { %v258_v61 = vsel %vm251_vm6, %v474_v60, 0.0 }
 0x2d7   :  { %259 = vadd.xlane.f32.xlu0 %v258_v61 }
 0x364   :  { %v260_v62 = vpop.xlane.xlu0 %259 }
 0x365   :  { %475 = vrcp.f32 %v260_v62 }
 0x36f   :  { %v476_v63 = vpop.eup %475 }
 0x370   :  { %v262_v1 = vmul.f32 %v476_v63, %v474_v60 }
 0x372   :  { %v266_v4 = vrot.slane %v262_v1, %v719_v21  ;;  %379 = vst.msk [vmem:[#allocation8] sm:$0x3] %vm251_vm6, %v262_v1  ;;  %v273_v8 = vrot.slane %v262_v1, %v213_v35 }
 0x374   :  { %268 = vbcast.lane.b32.xlu1 %v266_v4, 256 }
 0x378   :  { %275 = vbcast.lane.b32.xlu1 %v273_v8, 256 }
 0x3e6   :  { %v269_v10 = vpop.permute.xlu1 %268 }
 0x3e7   :  { %v277_v11 = vmul.f32 %v269_v10, %v721_v24 }
 0x3e9   :  { %v279_v12 = vsel %vm79_vm1, %v277_v11, 0.0 }
 0x3ea   :  { %v280_v13 = vrot.slane %v279_v12, 4  ;;  %v276_v14 = vpop.permute.xlu1 %275 }
 0x3eb   :  { %v278_v15 = vmul.f32 %v276_v14, %v724_v27 }
 0x3ec   :  { %v281_v16 = vadd.f32 %v280_v13, %v279_v12 }
 0x3ed   :  { %v286_v17 = vsel %vm79_vm1, %v278_v15, 0.0 }
 0x3ee   :  { %v282_v18 = vrot.slane %v281_v16, 2  ;;  %v287_v0 = vrot.slane %v286_v17, 4 }
 0x3f0   :  { %v283_v19 = vadd.f32 %v282_v18, %v281_v16  ;;  %v288_v20 = vadd.f32 %v287_v0, %v286_v17 }
 0x3f2   :  { %v289_v21 = vrot.slane %v288_v20, 2  ;;  %v284_v22 = vrot.slane %v283_v19, 1 }
 0x3f4   :  { %v290_v23 = vadd.f32 %v289_v21, %v288_v20  ;;  %v285_v26 = vadd.f32 %v284_v22, %v283_v19 }
 0x3f6   :  { %v291_v25 = vrot.slane %v290_v23, 1 }
 0x3f8   :  { %v292_v28 = vadd.f32 %v291_v25, %v290_v23 }
 0x3fa   :  { %v306_v24 = vsel %vm247_vm5, %v292_v28, %v285_v26 }
 0x3fb   :  { %445 = vmatmul.mubr.msk.f32.vlgmr.msra.gmra.mrb[0].mxu1 %vm79_vm1, %v306_v24 }
 0x3fc   :  { %554 = shalt.err (!%p551_p0)
}
 0x3fd   :  { %s555_s26 = scalar_lea.hbm %s784_s7, 32 }
 0x3fe   :  { %p556_p1 = scmp.ne.s32.totalorder %s784_s7, %s555_s26  ;;  %p559_p2 = scmp.lt.u32.totalorder %s555_s26, %s784_s7 }
 0x400   :  { %p561_p3 = pnand %p559_p2, %p556_p1 }
 0x402   :  { %564 = shalt.err (!%p561_p3)
}
 0x403   :  { %390 = dma.vmem_to_hbm [thread:$0]  %s388_s22, 32, %s784_s7, [#allocation4]   ;;  %v413_v27 = vld [vmem:[%s783_s6] ss:$0 sm:$0xff] }
 0x404   :  { %s606_s13 = smov [#allocation9]  }
 0x405   :  { %s397_s14 = sshll.u32 %s606_s13, 4  ;;  %s398_s14 = int_to_ptr.vmem [resolvable:$true] %s397_s14 }
 0x406   :  { %s565_s15 = scalar_lea.vmem %s398_s14, 32  ;;  %p570_p5 = scmp.lt.s32.totalorder %s398_s14, %s398_s14 }
 0x407   :  { %p566_p4 = scmp.ne.s32.totalorder %s398_s14, %s565_s15  ;;  %p571_p6 = scmp.lt.s32.totalorder %s565_s15, %s565_s15 }
 0x409   :  { %p572_p7 = por %p571_p6, %p570_p5 }
 0x40b   :  { %p573_p8 = pnand %p572_p7, %p566_p4 }
 0x4ce   :  { %v375_v29 = vpop.f32.mrb[0].mxu1 }
 0x4cf   :  { %v376_v30 = vadd.f32 %v413_v27, %v375_v29  ;;  %v446_v31 = vpop.f32.mrb[1].mxu1 }
 0x4d1   :  { %380 = vst.msk [vmem:[#allocation9] sm:$0x3] %vm161_vm2, %v376_v30 }
 0x4d2   :  { %576 = shalt.err (!%p573_p8)
}
 0x4d3   :  { %s577_s19 = scalar_lea.hbm %s785_s8, 32 }
 0x4d4   :  { %p578_p9 = scmp.ne.s32.totalorder %s785_s8, %s577_s19  ;;  %p581_p10 = scmp.lt.u32.totalorder %s577_s19, %s785_s8 }
 0x4d6   :  { %p583_p11 = pnand %p581_p10, %p578_p9 }
 0x4d8   :  { %586 = shalt.err (!%p583_p11)
}
 0x4d9   :  { %400 = dma.vmem_to_hbm [thread:$0]  %s398_s14, 32, %s785_s8, [#allocation10]  }
 0x4da   :  { %591 = dma.done.wait [#allocation4], 32  }
 0x4db   :  { %592 = vsyncadd [#allocation4], 4294967264 }
 0x4dc   :  { %593 = dma.done.wait [#allocation10], 32  }
 0x4dd   :  { %594 = vsyncadd [#allocation10], 4294967264 }
 0x4de   :  { %407 = vsyncpa [#allocation3], 1 }
 0x4df   :  { %408 = vsyncpa [#allocation6], 1 }
 0x4e0   :  { %409 = vsyncpa [#allocation4], 1 }
 0x4e1   :  { %410 = vsyncpa [#allocation10], 1 }

</bundles_post_ra>
